<compile_context>
chip_gen: v6e
topology: v6e:2x2x1
jax: 0.10.0
libtpu: 0.0.40
codegen_flags: <defaults>
</compile_context>

<pallas_src>
import jax
import jax.numpy as jnp
from jax.experimental import pallas as pl
from jax.experimental.pallas import tpu as pltpu


def _round_up(x, m):
    return (x + m - 1) // m * m


def _mlp_kernel(x_ref, w1_ref, b1_ref, w2_ref, b2_ref, w3_ref, b3_ref, o_ref):
    # Layer 1: Linear(in_feat -> 256) + ReLU  (bf16 MXU inputs, f32 accumulate)
    h1 = jnp.dot(x_ref[...], w1_ref[...], preferred_element_type=jnp.float32)
    h1 = jnp.maximum(h1 + b1_ref[...], 0.0)            # f32 VPU work (free, MXU out is f32)
    # Layer 2: Linear(256 -> 64, lane-padded to 128) + ReLU
    h2 = jnp.dot(h1.astype(w2_ref.dtype), w2_ref[...],
                 preferred_element_type=jnp.float32)
    h2 = jnp.maximum(h2 + b2_ref[...], 0.0)
    # Layer 3: Linear(64 -> out_feat, both lane-padded to 128)
    o = jnp.dot(h2.astype(w3_ref.dtype), w3_ref[...],
                preferred_element_type=jnp.float32)
    o_ref[...] = (o + b3_ref[...]).astype(o_ref.dtype)


def hebbian_mlp_forward(x_nchw, params, *, tm=128):
    """x_nchw: (N, C, H, W) float32. params: dict of f32 weights/biases (w stored (in,out))."""
    n = x_nchw.shape[0]
    x_flat = x_nchw.reshape(n, -1)                      # same as torch .view(N, -1)
    in_feat = x_flat.shape[1]

    w1, b1 = params["w1"], params["b1"]                 # (in_feat, 256), (1, 256)
    w2, b2 = params["w2"], params["b2"]                 # (256, 64),      (1, 64)
    w3, b3 = params["w3"], params["b3"]                 # (64, out_feat), (1, out_feat)
    h1_dim = w1.shape[1]                                # 256 (already lane-aligned)
    h2_dim = w2.shape[1]                                # 64
    out_feat = w3.shape[1]

    # Lane / sublane padding.
    in_pad = _round_up(in_feat, 128)
    h2_pad = _round_up(h2_dim, 128)                     # 64  -> 128
    out_pad = _round_up(out_feat, 128)                  # 10  -> 128
    tm = min(tm, _round_up(n, 8))                       # batch tile (>= one sublane)
    n_pad = _round_up(n, tm)
    grid = (n_pad // tm,)

    bf16 = jnp.bfloat16
    # Zero-padded, bf16-cast operands (zero pads are mathematically inert).
    x_p = jnp.zeros((n_pad, in_pad), bf16).at[:n, :in_feat].set(x_flat.astype(bf16))
    w1_p = jnp.zeros((in_pad, h1_dim), bf16).at[:in_feat, :].set(w1.astype(bf16))
    b1_p = b1.astype(jnp.float32)
    w2_p = jnp.zeros((h1_dim, h2_pad), bf16).at[:, :h2_dim].set(w2.astype(bf16))
    b2_p = jnp.zeros((1, h2_pad), jnp.float32).at[:, :h2_dim].set(b2)
    w3_p = jnp.zeros((h2_pad, out_pad), bf16).at[:h2_dim, :out_feat].set(w3.astype(bf16))
    b3_p = jnp.zeros((1, out_pad), jnp.float32).at[:, :out_feat].set(b3)

    # VMEM budget from the actual resident buffers (x/out double-buffered by the
    # pipeline; weights are grid-invariant). Keep within v7x's 64 MiB physical.
    def nbytes(shape, dt):
        sz = 1
        for s in shape:
            sz *= s
        return sz * jnp.dtype(dt).itemsize

    needed = (2 * nbytes((tm, in_pad), bf16)
              + 2 * nbytes((tm, out_pad), jnp.float32)
              + 2 * (nbytes((in_pad, h1_dim), bf16)
                     + nbytes((h1_dim, h2_pad), bf16)
                     + nbytes((h2_pad, out_pad), bf16)
                     + nbytes((1, h1_dim), jnp.float32)
                     + nbytes((1, h2_pad), jnp.float32)
                     + nbytes((1, out_pad), jnp.float32))
              + (4 << 20))                              # compiler-internal headroom
    vmem_limit = min(max(needed, 32 << 20), 48 << 20)

    rep2 = lambda shape: pl.BlockSpec(shape, lambda i: (0, 0))   # grid-invariant operand

    out_p = pl.pallas_call(
        _mlp_kernel,
        out_shape=jax.ShapeDtypeStruct((n_pad, out_pad), jnp.float32),
        grid=grid,
        in_specs=[
            pl.BlockSpec((tm, in_pad), lambda i: (i, 0)),        # x tile, pipelined over batch
            rep2((in_pad, h1_dim)),
            rep2((1, h1_dim)),
            rep2((h1_dim, h2_pad)),
            rep2((1, h2_pad)),
            rep2((h2_pad, out_pad)),
            rep2((1, out_pad)),
        ],
        out_specs=pl.BlockSpec((tm, out_pad), lambda i: (i, 0)),
        compiler_params=pltpu.CompilerParams(
            dimension_semantics=("parallel",),
            vmem_limit_bytes=int(vmem_limit),
        ),
    )(x_p, w1_p, b1_p, w2_p, b2_p, w3_p, b3_p)

    return out_p[:n, :out_feat]


def init_params(key, input_features, output_features):
    """Deterministic init matching nn.Linear's U(-1/sqrt(fan_in), 1/sqrt(fan_in))."""
    dims = [(input_features, 256), (256, 64), (64, output_features)]
    params = {}
    keys = jax.random.split(key, 2 * len(dims))
    for i, (fan_in, fan_out) in enumerate(dims):
        bound = 1.0 / jnp.sqrt(jnp.float32(fan_in))
        w = jax.random.uniform(keys[2 * i], (fan_in, fan_out),
                               minval=-bound, maxval=bound, dtype=jnp.float32)
        b = jax.random.uniform(keys[2 * i + 1], (1, fan_out),
                               minval=-bound, maxval=bound, dtype=jnp.float32)
        params[f"w{i + 1}"] = w
        params[f"b{i + 1}"] = b
    return params


def reference_forward(x_nchw, params):
    x = x_nchw.reshape(x_nchw.shape[0], -1)
    h = jnp.maximum(x @ params["w1"] + params["b1"], 0.0)
    h = jnp.maximum(h @ params["w2"] + params["b2"], 0.0)
    return h @ params["w3"] + params["b3"]


if __name__ == "__main__":
    key = jax.random.PRNGKey(0)
    k_x, k_p = jax.random.split(key)

    # Small NCHW input: batch=2, channels=4, spatial=16x16 -> input_features=1024
    x = jax.random.normal(k_x, (2, 4, 16, 16), dtype=jnp.float32)
    input_features = 4 * 16 * 16
    output_features = 10

    params = init_params(k_p, input_features, output_features)

    out = hebbian_mlp_forward(x, params)
    out = jax.block_until_ready(out)

    ref = reference_forward(x, params)
    assert out.shape == (2, output_features)
    # bf16 matmul inputs (f32 accumulation) -> loosened tolerance vs. f32 reference.
    assert jnp.allclose(out, ref, atol=3e-2, rtol=3e-2), "mismatch vs. pure-JAX reference"

    print("KERNEL_OK")
</pallas_src>

<mosaic_0001>
module attributes {stable_mosaic.version = 11 : i64} {
  func.func @_mlp_kernel(%arg0: i32, %arg1: memref<8x1024xbf16, #tpu.memory_space<vmem>>, %arg2: memref<1024x256xbf16, #tpu.memory_space<vmem>>, %arg3: memref<1x256xf32, #tpu.memory_space<vmem>>, %arg4: memref<256x128xbf16, #tpu.memory_space<vmem>>, %arg5: memref<1x128xf32, #tpu.memory_space<vmem>>, %arg6: memref<128x128xbf16, #tpu.memory_space<vmem>>, %arg7: memref<1x128xf32, #tpu.memory_space<vmem>>, %arg8: memref<8x128xf32, #tpu.memory_space<vmem>>) attributes {dimension_semantics = [#tpu.dimension_semantics<parallel>], iteration_bounds = array<i64: 1>, scalar_prefetch = 0 : i64, scratch_operands = 0 : i64, tpu.core_type = #tpu.core_type<tc>, window_params = [{transform_indices = @transform_0, window_bounds = array<i64: 8, 1024>}, {pipeline_mode = #tpu.pipeline_mode<synchronous>, transform_indices = @transform_1, window_bounds = array<i64: 1024, 256>}, {pipeline_mode = #tpu.pipeline_mode<synchronous>, transform_indices = @transform_2, window_bounds = array<i64: 1, 256>}, {pipeline_mode = #tpu.pipeline_mode<synchronous>, transform_indices = @transform_3, window_bounds = array<i64: 256, 128>}, {pipeline_mode = #tpu.pipeline_mode<synchronous>, transform_indices = @transform_4, window_bounds = array<i64: 1, 128>}, {pipeline_mode = #tpu.pipeline_mode<synchronous>, transform_indices = @transform_5, window_bounds = array<i64: 128, 128>}, {pipeline_mode = #tpu.pipeline_mode<synchronous>, transform_indices = @transform_6, window_bounds = array<i64: 1, 128>}, {transform_indices = @transform_7, window_bounds = array<i64: 8, 128>}]} {
    %c0 = arith.constant 0 : index
    %c0_0 = arith.constant 0 : index
    %0 = vector.load %arg1[%c0, %c0_0] : memref<8x1024xbf16, #tpu.memory_space<vmem>>, vector<8x1024xbf16>
    %c0_1 = arith.constant 0 : index
    %c0_2 = arith.constant 0 : index
    %1 = vector.load %arg2[%c0_1, %c0_2] : memref<1024x256xbf16, #tpu.memory_space<vmem>>, vector<1024x256xbf16>
    %cst = arith.constant dense<0.000000e+00> : vector<8x256xf32>
    %2 = tpu.matmul %0, %1, %cst {dimension_numbers = #tpu.dot_dimension_numbers<[1], [0], [0], [1], [0, 0, 1, 1], [], []>} : vector<8x1024xbf16>, vector<1024x256xbf16>, vector<8x256xf32> -> vector<8x256xf32>
    %c0_3 = arith.constant 0 : index
    %c0_4 = arith.constant 0 : index
    %3 = vector.load %arg3[%c0_3, %c0_4] : memref<1x256xf32, #tpu.memory_space<vmem>>, vector<1x256xf32>
    %4 = vector.broadcast %3 : vector<1x256xf32> to vector<8x256xf32>
    %5 = arith.addf %2, %4 : vector<8x256xf32>
    %cst_5 = arith.constant 0.000000e+00 : f32
    %6 = vector.broadcast %cst_5 : f32 to vector<8x256xf32>
    %7 = arith.maximumf %5, %6 : vector<8x256xf32>
    %8 = arith.truncf %7 : vector<8x256xf32> to vector<8x256xbf16>
    %c0_6 = arith.constant 0 : index
    %c0_7 = arith.constant 0 : index
    %9 = vector.load %arg4[%c0_6, %c0_7] : memref<256x128xbf16, #tpu.memory_space<vmem>>, vector<256x128xbf16>
    %cst_8 = arith.constant dense<0.000000e+00> : vector<8x128xf32>
    %10 = tpu.matmul %8, %9, %cst_8 {dimension_numbers = #tpu.dot_dimension_numbers<[1], [0], [0], [1], [0, 0, 1, 1], [], []>} : vector<8x256xbf16>, vector<256x128xbf16>, vector<8x128xf32> -> vector<8x128xf32>
    %c0_9 = arith.constant 0 : index
    %c0_10 = arith.constant 0 : index
    %11 = vector.load %arg5[%c0_9, %c0_10] : memref<1x128xf32, #tpu.memory_space<vmem>>, vector<1x128xf32>
    %12 = vector.broadcast %11 : vector<1x128xf32> to vector<8x128xf32>
    %13 = arith.addf %10, %12 : vector<8x128xf32>
    %cst_11 = arith.constant 0.000000e+00 : f32
    %14 = vector.broadcast %cst_11 : f32 to vector<8x128xf32>
    %15 = arith.maximumf %13, %14 : vector<8x128xf32>
    %16 = arith.truncf %15 : vector<8x128xf32> to vector<8x128xbf16>
    %c0_12 = arith.constant 0 : index
    %c0_13 = arith.constant 0 : index
    %17 = vector.load %arg6[%c0_12, %c0_13] : memref<128x128xbf16, #tpu.memory_space<vmem>>, vector<128x128xbf16>
    %cst_14 = arith.constant dense<0.000000e+00> : vector<8x128xf32>
    %18 = tpu.matmul %16, %17, %cst_14 {dimension_numbers = #tpu.dot_dimension_numbers<[1], [0], [0], [1], [0, 0, 1, 1], [], []>} : vector<8x128xbf16>, vector<128x128xbf16>, vector<8x128xf32> -> vector<8x128xf32>
    %c0_15 = arith.constant 0 : index
    %c0_16 = arith.constant 0 : index
    %19 = vector.load %arg7[%c0_15, %c0_16] : memref<1x128xf32, #tpu.memory_space<vmem>>, vector<1x128xf32>
    %20 = vector.broadcast %19 : vector<1x128xf32> to vector<8x128xf32>
    %21 = arith.addf %18, %20 : vector<8x128xf32>
    %c0_17 = arith.constant 0 : index
    %c0_18 = arith.constant 0 : index
    %22 = vector.load %arg8[%c0_17, %c0_18] : memref<8x128xf32, #tpu.memory_space<vmem>>, vector<8x128xf32>
    tpu.vector_store %arg8[%c0_17, %c0_18], %21 {strides = array<i32>} : memref<8x128xf32, #tpu.memory_space<vmem>>, vector<8x128xf32>,
    return
  }
  func.func @transform_0(%arg0: i32) -> (i32, i32) {
    %c0_i32 = arith.constant 0 : i32
    %c0_i32_0 = arith.constant 0 : i32
    return %arg0, %c0_i32 : i32, i32
  }
  func.func @transform_1(%arg0: i32) -> (i32, i32) {
    %c0_i32 = arith.constant 0 : i32
    %c0_i32_0 = arith.constant 0 : i32
    %c0_i32_1 = arith.constant 0 : i32
    return %c0_i32, %c0_i32_0 : i32, i32
  }
  func.func @transform_2(%arg0: i32) -> (i32, i32) {
    %c0_i32 = arith.constant 0 : i32
    %c0_i32_0 = arith.constant 0 : i32
    %c0_i32_1 = arith.constant 0 : i32
    return %c0_i32, %c0_i32_0 : i32, i32
  }
  func.func @transform_3(%arg0: i32) -> (i32, i32) {
    %c0_i32 = arith.constant 0 : i32
    %c0_i32_0 = arith.constant 0 : i32
    %c0_i32_1 = arith.constant 0 : i32
    return %c0_i32, %c0_i32_0 : i32, i32
  }
  func.func @transform_4(%arg0: i32) -> (i32, i32) {
    %c0_i32 = arith.constant 0 : i32
    %c0_i32_0 = arith.constant 0 : i32
    %c0_i32_1 = arith.constant 0 : i32
    return %c0_i32, %c0_i32_0 : i32, i32
  }
  func.func @transform_5(%arg0: i32) -> (i32, i32) {
    %c0_i32 = arith.constant 0 : i32
    %c0_i32_0 = arith.constant 0 : i32
    %c0_i32_1 = arith.constant 0 : i32
    return %c0_i32, %c0_i32_0 : i32, i32
  }
  func.func @transform_6(%arg0: i32) -> (i32, i32) {
    %c0_i32 = arith.constant 0 : i32
    %c0_i32_0 = arith.constant 0 : i32
    %c0_i32_1 = arith.constant 0 : i32
    return %c0_i32, %c0_i32_0 : i32, i32
  }
  func.func @transform_7(%arg0: i32) -> (i32, i32) {
    %c0_i32 = arith.constant 0 : i32
    %c0_i32_0 = arith.constant 0 : i32
    return %arg0, %c0_i32 : i32, i32
  }
}

</mosaic_0001>

<bundles_post_ra>
// kernel: tpu_custom_call.1
= control target key start
LH: loop header
LB: loop body
LE: loop exit
PB: predicated region body
PF: predicated region fallthrough
CT: control target
= control target key end

     0   :  { %12 = vsyncpa [#allocation3], 0  ;;  %s2010_s0 = inlined_call_operand.hbm [shape: bf16[8,1024], index: 0, kind: input, shape index: {}]   ;;  %s2011_s1 = inlined_call_operand.hbm [shape: bf16[1024,256], index: 1, kind: input, shape index: {}]   ;;  %s2012_s2 = inlined_call_operand.vmem [shape: f32[1,256], index: 2, kind: input, shape index: {}]   ;;  %s2013_s3 = inlined_call_operand.hbm [shape: bf16[256,128], index: 3, kind: input, shape index: {}]   ;;  %s2014_s4 = inlined_call_operand.vmem [shape: f32[1,128], index: 4, kind: input, shape index: {}]   ;;  %s2015_s5 = inlined_call_operand.hbm [shape: bf16[128,128], index: 5, kind: input, shape index: {}]   ;;  %s2016_s6 = inlined_call_operand.vmem [shape: f32[1,128], index: 6, kind: input, shape index: {}]   ;;  %s2017_s7 = inlined_call_operand.hbm [shape: f32[8,128], index: 7, kind: output, shape index: {}]  }
   0x1   :  { %13 = vsyncpa [#allocation6], 0 }
   0x2   :  { %14 = vsyncpa [#allocation9], 0 }
   0x3   :  { %15 = vsyncpa [#allocation4], 0  ;;  %s1923_s24 = smov [#allocation5]  }
   0x4   :  { %s31_s25 = sshll.u32 %s1923_s24, 4  ;;  %s32_s25 = int_to_ptr.vmem [resolvable:$true] %s31_s25 }
   0x5   :  { %s1823_s26 = scalar_lea.vmem %s32_s25, 16384  ;;  %p1828_p1 = scmp.lt.s32.totalorder %s32_s25, %s32_s25 }
   0x6   :  { %p1824_p0 = scmp.ne.s32.totalorder %s32_s25, %s1823_s26  ;;  %p1829_p2 = scmp.lt.s32.totalorder %s1823_s26, %s1823_s26 }
   0x8   :  { %p1830_p3 = por %p1829_p2, %p1828_p1 }
   0xa   :  { %p1831_p4 = pnand %p1830_p3, %p1824_p0 }
   0xc   :  { %1834 = shalt.err (!%p1831_p4)
}
   0xd   :  { %s1924_s27 = smov 128   ;;  %s1925_s28 = smov 8  }
   0xe   :  { %37 = dma.hbm_to_vmem [thread:$0]  %s2011_s1, 16384, %s32_s25, [#allocation6], %s1924_s27, %s1924_s27, %s1925_s28  }
   0xf   :  { %s1926_s8 = smov [#allocation2]   ;;  %s1927_s10 = smov [#allocation7]  }
  0x10   :  { %s22_s9 = sshll.u32 %s1926_s8, 4  ;;  %s45_s11 = sshll.u32 %s1927_s10, 4  ;;  %s23_s9 = int_to_ptr.vmem [resolvable:$true] %s22_s9  ;;  %s46_s11 = int_to_ptr.vmem [resolvable:$true] %s45_s11 }
  0x11   :  { %s1843_s12 = scalar_lea.vmem %s23_s9, 512  ;;  %p1848_p6 = scmp.lt.s32.totalorder %s23_s9, %s23_s9 }
  0x12   :  { %p1844_p5 = scmp.ne.s32.totalorder %s23_s9, %s1843_s12  ;;  %p1849_p7 = scmp.lt.s32.totalorder %s1843_s12, %s1843_s12 }
  0x14   :  { %p1850_p8 = por %p1849_p7, %p1848_p6 }
  0x16   :  { %p1851_p9 = pnand %p1850_p8, %p1844_p5 }
  0x18   :  { %1854 = shalt.err (!%p1851_p9)
}
  0x19   :  { %25 = dma.hbm_to_vmem [thread:$0]  %s2010_s0, 512, %s23_s9, [#allocation3]  }
  0x1a   :  { %s1863_s15 = scalar_lea.vmem %s46_s11, 2048  ;;  %p1868_p11 = scmp.lt.s32.totalorder %s46_s11, %s46_s11 }
  0x1b   :  { %p1864_p10 = scmp.ne.s32.totalorder %s46_s11, %s1863_s15  ;;  %p1869_p12 = scmp.lt.s32.totalorder %s1863_s15, %s1863_s15 }
  0x1d   :  { %p1870_p13 = por %p1869_p12, %p1868_p11 }
  0x1f   :  { %p1871_p0 = pnand %p1870_p13, %p1864_p10 }
  0x21   :  { %1874 = shalt.err (!%p1871_p0)
}
  0x22   :  { %s1928_s1 = smov 64   ;;  %s1929_s16 = smov 4  }
  0x23   :  { %51 = dma.hbm_to_vmem [thread:$0]  %s2013_s3, 2048, %s46_s11, [#allocation6], %s1928_s1, %s1928_s1, %s1929_s16  }
  0x24   :  { %s1930_s19 = smov [#allocation8]  }
  0x25   :  { %s59_s20 = sshll.u32 %s1930_s19, 4  ;;  %s60_s20 = int_to_ptr.vmem [resolvable:$true] %s59_s20 }
  0x26   :  { %s1883_s21 = scalar_lea.vmem %s60_s20, 1024  ;;  %p1888_p2 = scmp.lt.s32.totalorder %s60_s20, %s60_s20 }
  0x27   :  { %p1884_p1 = scmp.ne.s32.totalorder %s60_s20, %s1883_s21  ;;  %p1889_p3 = scmp.lt.s32.totalorder %s1883_s21, %s1883_s21 }
  0x29   :  { %p1890_p4 = por %p1889_p3, %p1888_p2 }
  0x2b   :  { %p1891_p5 = pnand %p1890_p4, %p1884_p1 }
  0x2d   :  { %1894 = shalt.err (!%p1891_p5)
}
  0x2e   :  { %65 = dma.hbm_to_vmem [thread:$0]  %s2015_s5, 1024, %s60_s20, [#allocation9], %s1928_s1, %s1928_s1, %s1929_s16  }
  0x2f   :  { %1915 = dma.done.wait [#allocation3], 512  }
  0x30   :  { %1916 = vsyncadd [#allocation3], 4294966784 }
  0x31   :  { %1917 = dma.done.wait [#allocation6], 18432  }
  0x32   :  { %1918 = vsyncadd [#allocation6], 4294948864 }
  0x33   :  { %1919 = dma.done.wait [#allocation9], 1024  }
  0x34   :  { %1920 = vsyncadd [#allocation9], 4294966272  ;;  %v1591_v0 = vld [vmem:[#allocation5 + $0x74] ss:$8 sps:$4 sm:$0xff]   ;;  %v1595_v2 = vld [vmem:[#allocation5 + $0x70] ss:$8 sps:$4 sm:$0xff]  }
  0x35   :  { %v1593_v1 = vld [vmem:[#allocation5 + $0x174] ss:$8 sps:$4 sm:$0xff]   ;;  %893 = vmatprep.subr.bf16.mxu0 %v1591_v0  ;;  %v1596_v3 = vld [vmem:[#allocation5 + $0x170] ss:$8 sps:$4 sm:$0xff]   ;;  %v1597_v4 = vld [vmem:[#allocation5 + $0x64] ss:$8 sps:$4 sm:$0xff]  }
  0x36   :  { %934 = vmatprep.subr.bf16.mxu1 %v1593_v1  ;;  %894 = vmatpush1.bf16.msra.mxu0 %v1595_v2  ;;  %v1599_v5 = vld [vmem:[#allocation5 + $0x164] ss:$8 sps:$4 sm:$0xff]   ;;  %v1601_v6 = vld [vmem:[#allocation5 + $0x60] ss:$8 sps:$4 sm:$0xff]   ;;  %v1603_v8 = vld [vmem:[#allocation5 + $0x54] ss:$8 sps:$4 sm:$0xff]  }
  0x37   :  { %935 = vmatpush1.bf16.msra.mxu1 %v1596_v3  ;;  %895 = vmatprep.subr.bf16.mxu0 %v1597_v4  ;;  %v1602_v7 = vld [vmem:[#allocation5 + $0x160] ss:$8 sps:$4 sm:$0xff]   ;;  %v1605_v9 = vld [vmem:[#allocation5 + $0x154] ss:$8 sps:$4 sm:$0xff]   ;;  %v1607_v10 = vld [vmem:[#allocation5 + $0x50] ss:$8 sps:$4 sm:$0xff]  }
  0x38   :  { %936 = vmatprep.subr.bf16.mxu1 %v1599_v5  ;;  %v1608_v11 = vld [vmem:[#allocation5 + $0x150] ss:$8 sps:$4 sm:$0xff]   ;;  %v1609_v12 = vld [vmem:[#allocation5 + $0x44] ss:$8 sps:$4 sm:$0xff]   ;;  %v1613_v14 = vld [vmem:[#allocation5 + $0x40] ss:$8 sps:$4 sm:$0xff]  }
  0x39   :  { %v1611_v13 = vld [vmem:[#allocation5 + $0x144] ss:$8 sps:$4 sm:$0xff]   ;;  %v1614_v15 = vld [vmem:[#allocation5 + $0x140] ss:$8 sps:$4 sm:$0xff]   ;;  %v1615_v16 = vld [vmem:[#allocation5 + $0x34] ss:$8 sps:$4 sm:$0xff]  }
  0x3a   :  { %896 = vmatpush1.bf16.msra.mxu0 %v1601_v6  ;;  %v1617_v17 = vld [vmem:[#allocation5 + $0x134] ss:$8 sps:$4 sm:$0xff]   ;;  %v1619_v18 = vld [vmem:[#allocation5 + $0x30] ss:$8 sps:$4 sm:$0xff]   ;;  %v1621_v20 = vld [vmem:[#allocation5 + $0x24] ss:$8 sps:$4 sm:$0xff]  }
  0x3b   :  { %937 = vmatpush1.bf16.msra.mxu1 %v1602_v7  ;;  %897 = vmatprep.subr.bf16.mxu0 %v1603_v8  ;;  %v1620_v19 = vld [vmem:[#allocation5 + $0x130] ss:$8 sps:$4 sm:$0xff]   ;;  %v1623_v21 = vld [vmem:[#allocation5 + $0x124] ss:$8 sps:$4 sm:$0xff]   ;;  %v1625_v22 = vld [vmem:[#allocation5 + $0x20] ss:$8 sps:$4 sm:$0xff]  }
  0x3c   :  { %938 = vmatprep.subr.bf16.mxu1 %v1605_v9  ;;  %v1626_v23 = vld [vmem:[#allocation5 + $0x120] ss:$8 sps:$4 sm:$0xff]   ;;  %v1627_v24 = vld [vmem:[#allocation5 + $0x14] ss:$8 sps:$4 sm:$0xff]   ;;  %v1631_v26 = vld [vmem:[#allocation5 + $0x10] ss:$8 sps:$4 sm:$0xff]  }
  0x3d   :  { %v1629_v25 = vld [vmem:[#allocation5 + $0x114] ss:$8 sps:$4 sm:$0xff]   ;;  %v1632_v27 = vld [vmem:[#allocation5 + $0x110] ss:$8 sps:$4 sm:$0xff]   ;;  %v1633_v28 = vld [vmem:[#allocation5 + $0x4] ss:$8 sps:$4 sm:$0xff]  }
  0x3e   :  { %898 = vmatpush1.bf16.msra.mxu0 %v1607_v10  ;;  %v1635_v29 = vld [vmem:[#allocation5 + $0x104] ss:$8 sps:$4 sm:$0xff]   ;;  %v1637_v30 = vld [vmem:[#allocation5] ss:$8 sps:$4 sm:$0xff]   ;;  %v1639_v32 = vld [vmem:[#allocation5 + $0xf4] ss:$8 sps:$4 sm:$0xff]  }
  0x3f   :  { %939 = vmatpush1.bf16.msra.mxu1 %v1608_v11  ;;  %899 = vmatprep.subr.bf16.mxu0 %v1609_v12  ;;  %v1638_v31 = vld [vmem:[#allocation5 + $0x100] ss:$8 sps:$4 sm:$0xff]   ;;  %v1641_v33 = vld [vmem:[#allocation5 + $0x1f4] ss:$8 sps:$4 sm:$0xff]   ;;  %v1643_v34 = vld [vmem:[#allocation5 + $0xf0] ss:$8 sps:$4 sm:$0xff]  }
  0x40   :  { %940 = vmatprep.subr.bf16.mxu1 %v1611_v13  ;;  %v1644_v35 = vld [vmem:[#allocation5 + $0x1f0] ss:$8 sps:$4 sm:$0xff]   ;;  %v1645_v36 = vld [vmem:[#allocation5 + $0xe4] ss:$8 sps:$4 sm:$0xff]   ;;  %v1649_v38 = vld [vmem:[#allocation5 + $0xe0] ss:$8 sps:$4 sm:$0xff]  }
  0x41   :  { %v1647_v37 = vld [vmem:[#allocation5 + $0x1e4] ss:$8 sps:$4 sm:$0xff]   ;;  %v1650_v39 = vld [vmem:[#allocation5 + $0x1e0] ss:$8 sps:$4 sm:$0xff]   ;;  %v1651_v40 = vld [vmem:[#allocation5 + $0xd4] ss:$8 sps:$4 sm:$0xff]  }
  0x42   :  { %900 = vmatpush1.bf16.msra.mxu0 %v1613_v14  ;;  %v1653_v41 = vld [vmem:[#allocation5 + $0x1d4] ss:$8 sps:$4 sm:$0xff]   ;;  %v1655_v42 = vld [vmem:[#allocation5 + $0xd0] ss:$8 sps:$4 sm:$0xff]   ;;  %v1657_v44 = vld [vmem:[#allocation5 + $0xc4] ss:$8 sps:$4 sm:$0xff]  }
  0x43   :  { %941 = vmatpush1.bf16.msra.mxu1 %v1614_v15  ;;  %901 = vmatprep.subr.bf16.mxu0 %v1615_v16  ;;  %v1656_v43 = vld [vmem:[#allocation5 + $0x1d0] ss:$8 sps:$4 sm:$0xff]   ;;  %v1659_v45 = vld [vmem:[#allocation5 + $0x1c4] ss:$8 sps:$4 sm:$0xff]   ;;  %v1661_v49 = vld [vmem:[#allocation5 + $0xc0] ss:$8 sps:$4 sm:$0xff]  }
  0x44   :  { %942 = vmatprep.subr.bf16.mxu1 %v1617_v17  ;;  %v81_v46 = vld [vmem:[#allocation2] sm:$0xff]  ;;  %v82_v48 = vld [vmem:[#allocation2 + $0x8] sm:$0xff]  ;;  %v1663_v52 = vld [vmem:[#allocation5 + $0xb4] ss:$8 sps:$4 sm:$0xff]   ;;  %vm1932_vm0 = vmmov 0   ;;  %s1933_s26 = smov [#allocation10]  }
  0x45   :  { %v1368_v47 = vcombine.high %v81_v46, %v81_v46  ;;  %v1662_v50 = vld [vmem:[#allocation5 + $0x1c0] ss:$8 sps:$4 sm:$0xff]   ;;  %v1370_v51 = vcombine.high %v82_v48, %v82_v48  ;;  %v1665_v53 = vld [vmem:[#allocation5 + $0x1b4] ss:$8 sps:$4 sm:$0xff]   ;;  %v1667_v54 = vld [vmem:[#allocation5 + $0xb0] ss:$8 sps:$4 sm:$0xff]   ;;  %v1367_v6 = vcombine.low %v81_v46, %v81_v46  ;;  %v1369_v7 = vcombine.low %v82_v48, %v82_v48 }
  0x46   :  { %902 = vmatpush1.bf16.msra.mxu0 %v1619_v18  ;;  %v1668_v55 = vld [vmem:[#allocation5 + $0x1b0] ss:$8 sps:$4 sm:$0xff]   ;;  %v1669_v56 = vld [vmem:[#allocation5 + $0xa4] ss:$8 sps:$4 sm:$0xff]   ;;  %v1673_v58 = vld [vmem:[#allocation5 + $0xa0] ss:$8 sps:$4 sm:$0xff]  }
  0x47   :  { %943 = vmatpush1.bf16.msra.mxu1 %v1620_v19  ;;  %903 = vmatprep.subr.bf16.mxu0 %v1621_v20  ;;  %v1671_v57 = vld [vmem:[#allocation5 + $0x1a4] ss:$8 sps:$4 sm:$0xff]   ;;  %v1674_v59 = vld [vmem:[#allocation5 + $0x1a0] ss:$8 sps:$4 sm:$0xff]   ;;  %v1675_v60 = vld [vmem:[#allocation5 + $0x94] ss:$8 sps:$4 sm:$0xff]  }
  0x48   :  { %944 = vmatprep.subr.bf16.mxu1 %v1623_v21  ;;  %925 = vmatprep.mubr.bf16.mxu0 %v1368_v47  ;;  %v1677_v61 = vld [vmem:[#allocation5 + $0x194] ss:$8 sps:$4 sm:$0xff]   ;;  %v1679_v62 = vld [vmem:[#allocation5 + $0x90] ss:$8 sps:$4 sm:$0xff]   ;;  %v1681_v0 = vld [vmem:[#allocation5 + $0x84] ss:$8 sps:$4 sm:$0xff]  }
  0x49   :  { %966 = vmatprep.mubr.bf16.mxu1 %v1370_v51  ;;  %v1680_v63 = vld [vmem:[#allocation5 + $0x190] ss:$8 sps:$4 sm:$0xff]   ;;  %v1683_v1 = vld [vmem:[#allocation5 + $0x184] ss:$8 sps:$4 sm:$0xff]   ;;  %v1685_v2 = vld [vmem:[#allocation5 + $0x80] ss:$8 sps:$4 sm:$0xff]  }
  0x4a   :  { %904 = vmatpush1.bf16.msra.mxu0 %v1625_v22  ;;  %v1686_v3 = vld [vmem:[#allocation5 + $0x180] ss:$8 sps:$4 sm:$0xff]   ;;  %v1693_v4 = vld [vmem:[#allocation5 + $0x274] ss:$8 sps:$4 sm:$0xff]   ;;  %v1691_v8 = vld [vmem:[#allocation5 + $0x270] ss:$8 sps:$4 sm:$0xff]  }
  0x4b   :  { %945 = vmatpush1.bf16.msra.mxu1 %v1626_v23  ;;  %905 = vmatprep.subr.bf16.mxu0 %v1627_v24  ;;  %v1696_v5 = vld [vmem:[#allocation5 + $0x374] ss:$8 sps:$4 sm:$0xff]   ;;  %v1694_v9 = vld [vmem:[#allocation5 + $0x370] ss:$8 sps:$4 sm:$0xff]   ;;  %v1699_v10 = vld [vmem:[#allocation5 + $0x264] ss:$8 sps:$4 sm:$0xff]  }
  0x4c   :  { %946 = vmatprep.subr.bf16.mxu1 %v1629_v25  ;;  %v1702_v11 = vld [vmem:[#allocation5 + $0x364] ss:$8 sps:$4 sm:$0xff]   ;;  %v1697_v12 = vld [vmem:[#allocation5 + $0x260] ss:$8 sps:$4 sm:$0xff]   ;;  %v1705_v14 = vld [vmem:[#allocation5 + $0x254] ss:$8 sps:$4 sm:$0xff]  }
  0x4d   :  { %v1700_v13 = vld [vmem:[#allocation5 + $0x360] ss:$8 sps:$4 sm:$0xff]   ;;  %v1708_v15 = vld [vmem:[#allocation5 + $0x354] ss:$8 sps:$4 sm:$0xff]   ;;  %v1703_v16 = vld [vmem:[#allocation5 + $0x250] ss:$8 sps:$4 sm:$0xff]  }
  0x4e   :  { %906 = vmatpush1.bf16.msra.mxu0 %v1631_v26  ;;  %v1706_v17 = vld [vmem:[#allocation5 + $0x350] ss:$8 sps:$4 sm:$0xff]   ;;  %v1711_v18 = vld [vmem:[#allocation5 + $0x244] ss:$8 sps:$4 sm:$0xff]   ;;  %v1709_v20 = vld [vmem:[#allocation5 + $0x240] ss:$8 sps:$4 sm:$0xff]  }
  0x4f   :  { %947 = vmatpush1.bf16.msra.mxu1 %v1632_v27  ;;  %907 = vmatprep.subr.bf16.mxu0 %v1633_v28  ;;  %v1714_v19 = vld [vmem:[#allocation5 + $0x344] ss:$8 sps:$4 sm:$0xff]   ;;  %v1712_v21 = vld [vmem:[#allocation5 + $0x340] ss:$8 sps:$4 sm:$0xff]   ;;  %v1717_v22 = vld [vmem:[#allocation5 + $0x234] ss:$8 sps:$4 sm:$0xff]  }
  0x50   :  { %948 = vmatprep.subr.bf16.mxu1 %v1635_v29  ;;  %v1720_v23 = vld [vmem:[#allocation5 + $0x334] ss:$8 sps:$4 sm:$0xff]   ;;  %v1715_v24 = vld [vmem:[#allocation5 + $0x230] ss:$8 sps:$4 sm:$0xff]   ;;  %v1723_v26 = vld [vmem:[#allocation5 + $0x224] ss:$8 sps:$4 sm:$0xff]  }
  0x51   :  { %v1718_v25 = vld [vmem:[#allocation5 + $0x330] ss:$8 sps:$4 sm:$0xff]   ;;  %v1726_v27 = vld [vmem:[#allocation5 + $0x324] ss:$8 sps:$4 sm:$0xff]   ;;  %v1721_v28 = vld [vmem:[#allocation5 + $0x220] ss:$8 sps:$4 sm:$0xff]  }
  0x52   :  { %908 = vmatpush1.bf16.msra.mxu0 %v1637_v30  ;;  %v1724_v29 = vld [vmem:[#allocation5 + $0x320] ss:$8 sps:$4 sm:$0xff]   ;;  %v1729_v30 = vld [vmem:[#allocation5 + $0x214] ss:$8 sps:$4 sm:$0xff]   ;;  %v1747_v46 = vld [vmem:[#allocation5 + $0x2e4] ss:$8 sps:$4 sm:$0xff]  }
  0x53   :  { %949 = vmatpush1.bf16.msra.mxu1 %v1638_v31  ;;  %909 = vmatprep.subr.bf16.mxu0 %v1639_v32  ;;  %v1732_v31 = vld [vmem:[#allocation5 + $0x314] ss:$8 sps:$4 sm:$0xff]   ;;  %v1727_v32 = vld [vmem:[#allocation5 + $0x210] ss:$8 sps:$4 sm:$0xff]   ;;  %v1750_v47 = vld [vmem:[#allocation5 + $0x3e4] ss:$8 sps:$4 sm:$0xff]  }
  0x54   :  { %950 = vmatprep.subr.bf16.mxu1 %v1641_v33  ;;  %v1730_v33 = vld [vmem:[#allocation5 + $0x310] ss:$8 sps:$4 sm:$0xff]   ;;  %v1745_v48 = vld [vmem:[#allocation5 + $0x2e0] ss:$8 sps:$4 sm:$0xff]   ;;  %v1756_v51 = vld [vmem:[#allocation5 + $0x3d4] ss:$8 sps:$4 sm:$0xff]  }
  0x55   :  { %s1356_s27 = sshll.u32 %s1933_s26, 4  ;;  %s1357_s27 = int_to_ptr.vmem [resolvable:$true] %s1356_s27 }
  0x56   :  { %910 = vmatpush2.bf16.msra.mxu0 %v1643_v34  ;;  %v1986_v34 = vld [vmem:[#allocation2 + $0x10] sm:$0xff]  ;;  %p1900_p7 = scmp.lt.s32.totalorder %s1357_s27, %s1357_s27 }
  0x57   :  { %951 = vmatpush2.bf16.msra.mxu1 %v1644_v35  ;;  %911 = vmatprep.subr.bf16.mxu0 %v1645_v36  ;;  %v1988_v35 = vld [vmem:[#allocation2 + $0x18] sm:$0xff]  ;;  %v1735_v36 = vld [vmem:[#allocation5 + $0x204] ss:$8 sps:$4 sm:$0xff]  }
  0x58   :  { %952 = vmatprep.subr.bf16.mxu1 %v1647_v37  ;;  %v1738_v37 = vld [vmem:[#allocation5 + $0x304] ss:$8 sps:$4 sm:$0xff]  }
  0x5a   :  { %912 = vmatpush2.bf16.msra.mxu0 %v1649_v38  ;;  %v1372_v38 = vcombine.high %v1986_v34, %v1986_v34 }
  0x5b   :  { %953 = vmatpush2.bf16.msra.mxu1 %v1650_v39  ;;  %913 = vmatprep.subr.bf16.mxu0 %v1651_v40  ;;  %v1374_v39 = vcombine.high %v1988_v35, %v1988_v35  ;;  %v1733_v40 = vld [vmem:[#allocation5 + $0x200] ss:$8 sps:$4 sm:$0xff]  }
  0x5c   :  { %954 = vmatprep.subr.bf16.mxu1 %v1653_v41  ;;  %v1736_v41 = vld [vmem:[#allocation5 + $0x300] ss:$8 sps:$4 sm:$0xff]  }
  0x5e   :  { %914 = vmatpush2.bf16.msra.mxu0 %v1655_v42  ;;  %v1741_v42 = vld [vmem:[#allocation5 + $0x2f4] ss:$8 sps:$4 sm:$0xff]  }
  0x5f   :  { %955 = vmatpush2.bf16.msra.mxu1 %v1656_v43  ;;  %915 = vmatprep.subr.bf16.mxu0 %v1657_v44  ;;  %v1744_v43 = vld [vmem:[#allocation5 + $0x3f4] ss:$8 sps:$4 sm:$0xff]   ;;  %v1739_v44 = vld [vmem:[#allocation5 + $0x2f0] ss:$8 sps:$4 sm:$0xff]  }
  0x60   :  { %956 = vmatprep.subr.bf16.mxu1 %v1659_v45  ;;  %v1742_v45 = vld [vmem:[#allocation5 + $0x3f0] ss:$8 sps:$4 sm:$0xff]  }
  0x62   :  { %916 = vmatpush2.bf16.msra.mxu0 %v1661_v49  ;;  %v1748_v49 = vld [vmem:[#allocation5 + $0x3e0] ss:$8 sps:$4 sm:$0xff]  }
  0x63   :  { %957 = vmatpush2.bf16.msra.mxu1 %v1662_v50  ;;  %917 = vmatprep.subr.bf16.mxu0 %v1663_v52  ;;  %v1753_v50 = vld [vmem:[#allocation5 + $0x2d4] ss:$8 sps:$4 sm:$0xff]   ;;  %v1751_v52 = vld [vmem:[#allocation5 + $0x2d0] ss:$8 sps:$4 sm:$0xff]  }
  0x64   :  { %958 = vmatprep.subr.bf16.mxu1 %v1665_v53  ;;  %v1754_v53 = vld [vmem:[#allocation5 + $0x3d0] ss:$8 sps:$4 sm:$0xff]  }
  0x66   :  { %918 = vmatpush2.bf16.msra.mxu0 %v1667_v54  ;;  %v1759_v54 = vld [vmem:[#allocation5 + $0x2c4] ss:$8 sps:$4 sm:$0xff]  }
  0x67   :  { %959 = vmatpush2.bf16.msra.mxu1 %v1668_v55  ;;  %919 = vmatprep.subr.bf16.mxu0 %v1669_v56  ;;  %v1762_v55 = vld [vmem:[#allocation5 + $0x3c4] ss:$8 sps:$4 sm:$0xff]   ;;  %v1757_v56 = vld [vmem:[#allocation5 + $0x2c0] ss:$8 sps:$4 sm:$0xff]  }
  0x68   :  { %960 = vmatprep.subr.bf16.mxu1 %v1671_v57  ;;  %v1760_v57 = vld [vmem:[#allocation5 + $0x3c0] ss:$8 sps:$4 sm:$0xff]  }
  0x6a   :  { %920 = vmatpush2.bf16.msra.mxu0 %v1673_v58  ;;  %v1765_v58 = vld [vmem:[#allocation5 + $0x2b4] ss:$8 sps:$4 sm:$0xff]  }
  0x6b   :  { %961 = vmatpush2.bf16.msra.mxu1 %v1674_v59  ;;  %921 = vmatprep.subr.bf16.mxu0 %v1675_v60  ;;  %v1768_v59 = vld [vmem:[#allocation5 + $0x3b4] ss:$8 sps:$4 sm:$0xff]   ;;  %v1763_v60 = vld [vmem:[#allocation5 + $0x2b0] ss:$8 sps:$4 sm:$0xff]  }
  0x6c   :  { %962 = vmatprep.subr.bf16.mxu1 %v1677_v61  ;;  %v1766_v61 = vld [vmem:[#allocation5 + $0x3b0] ss:$8 sps:$4 sm:$0xff]  }
  0x6e   :  { %922 = vmatpush2.bf16.msra.mxu0 %v1679_v62  ;;  %v1771_v62 = vld [vmem:[#allocation5 + $0x2a4] ss:$8 sps:$4 sm:$0xff]  }
  0x6f   :  { %963 = vmatpush2.bf16.msra.mxu1 %v1680_v63  ;;  %923 = vmatprep.subr.bf16.mxu0 %v1681_v0  ;;  %v1774_v63 = vld [vmem:[#allocation5 + $0x3a4] ss:$8 sps:$4 sm:$0xff]   ;;  %v1769_v0 = vld [vmem:[#allocation5 + $0x2a0] ss:$8 sps:$4 sm:$0xff]  }
  0x70   :  { %964 = vmatprep.subr.bf16.mxu1 %v1683_v1  ;;  %v1772_v1 = vld [vmem:[#allocation5 + $0x3a0] ss:$8 sps:$4 sm:$0xff]  }
  0x72   :  { %924 = vmatpush2.bf16.msra.mxu0 %v1685_v2  ;;  %v1777_v2 = vld [vmem:[#allocation5 + $0x294] ss:$8 sps:$4 sm:$0xff]  }
  0x73   :  { %965 = vmatpush2.bf16.msra.mxu1 %v1686_v3  ;;  %975 = vmatprep.subr.bf16.mxu0 %v1693_v4  ;;  %v1780_v3 = vld [vmem:[#allocation5 + $0x394] ss:$8 sps:$4 sm:$0xff]   ;;  %v1775_v4 = vld [vmem:[#allocation5 + $0x290] ss:$8 sps:$4 sm:$0xff]  }
  0x74   :  { %1016 = vmatprep.subr.bf16.mxu1 %v1696_v5  ;;  %v1778_v5 = vld [vmem:[#allocation5 + $0x390] ss:$8 sps:$4 sm:$0xff]  }
  0x75   :  { %926 = vmatmul.mubr.bf16.vlgmr.msra.gmra.mxu0 %v1367_v6  ;;  %v1783_v6 = vld [vmem:[#allocation5 + $0x284] ss:$8 sps:$4 sm:$0xff]  }
  0x76   :  { %967 = vmatmul.mubr.bf16.vlgmr.msra.gmra.mxu1 %v1369_v7  ;;  %976 = vmatpush1.bf16.msra.mxu0 %v1691_v8  ;;  %v1786_v7 = vld [vmem:[#allocation5 + $0x384] ss:$8 sps:$4 sm:$0xff]   ;;  %v1781_v8 = vld [vmem:[#allocation5 + $0x280] ss:$8 sps:$4 sm:$0xff]  }
  0x77   :  { %1017 = vmatpush1.bf16.msra.mxu1 %v1694_v9  ;;  %977 = vmatprep.subr.bf16.mxu0 %v1699_v10  ;;  %v1784_v9 = vld [vmem:[#allocation5 + $0x380] ss:$8 sps:$4 sm:$0xff]   ;;  %v1371_v10 = vcombine.low %v1986_v34, %v1986_v34 }
  0x78   :  { %1018 = vmatprep.subr.bf16.mxu1 %v1702_v11  ;;  %1007 = vmatprep.mubr.bf16.mxu0 %v1372_v38  ;;  %v1373_v11 = vcombine.low %v1988_v35, %v1988_v35 }
  0x79   :  { %1048 = vmatprep.mubr.bf16.mxu1 %v1374_v39 }
  0x7a   :  { %978 = vmatpush1.bf16.msra.mxu0 %v1697_v12  ;;  %v1791_v12 = vld [vmem:[#allocation7 + $0x78] sm:$0xff]  }
  0x7b   :  { %1019 = vmatpush1.bf16.msra.mxu1 %v1700_v13  ;;  %979 = vmatprep.subr.bf16.mxu0 %v1705_v14  ;;  %v1792_v13 = vld [vmem:[#allocation7 + $0x38] sm:$0xff]   ;;  %v1793_v14 = vld [vmem:[#allocation7 + $0x70] sm:$0xff]  }
  0x7c   :  { %1020 = vmatprep.subr.bf16.mxu1 %v1708_v15  ;;  %v1794_v15 = vld [vmem:[#allocation7 + $0x30] sm:$0xff]  }
  0x7e   :  { %980 = vmatpush1.bf16.msra.mxu0 %v1703_v16  ;;  %v1795_v16 = vld [vmem:[#allocation7 + $0x68] sm:$0xff]  }
  0x7f   :  { %1021 = vmatpush1.bf16.msra.mxu1 %v1706_v17  ;;  %981 = vmatprep.subr.bf16.mxu0 %v1711_v18  ;;  %v1796_v17 = vld [vmem:[#allocation7 + $0x28] sm:$0xff]   ;;  %v1797_v18 = vld [vmem:[#allocation7 + $0x60] sm:$0xff]  }
  0x80   :  { %1022 = vmatprep.subr.bf16.mxu1 %v1714_v19  ;;  %v1798_v19 = vld [vmem:[#allocation7 + $0x20] sm:$0xff]  }
  0x82   :  { %982 = vmatpush1.bf16.msra.mxu0 %v1709_v20  ;;  %v1799_v20 = vld [vmem:[#allocation7 + $0x58] sm:$0xff]  }
  0x83   :  { %1023 = vmatpush1.bf16.msra.mxu1 %v1712_v21  ;;  %983 = vmatprep.subr.bf16.mxu0 %v1717_v22  ;;  %v1800_v21 = vld [vmem:[#allocation7 + $0x18] sm:$0xff]   ;;  %v1801_v22 = vld [vmem:[#allocation7 + $0x50] sm:$0xff]  }
  0x84   :  { %1024 = vmatprep.subr.bf16.mxu1 %v1720_v23  ;;  %v1802_v23 = vld [vmem:[#allocation7 + $0x10] sm:$0xff]  }
  0x86   :  { %984 = vmatpush1.bf16.msra.mxu0 %v1715_v24  ;;  %v1803_v24 = vld [vmem:[#allocation7 + $0x48] sm:$0xff]  }
  0x87   :  { %1025 = vmatpush1.bf16.msra.mxu1 %v1718_v25  ;;  %985 = vmatprep.subr.bf16.mxu0 %v1723_v26  ;;  %v1804_v25 = vld [vmem:[#allocation7 + $0x8] sm:$0xff]   ;;  %v1805_v26 = vld [vmem:[#allocation7 + $0x40] sm:$0xff]  }
  0x88   :  { %1026 = vmatprep.subr.bf16.mxu1 %v1726_v27  ;;  %v1806_v27 = vld [vmem:[#allocation7] sm:$0xff]  }
  0x8a   :  { %986 = vmatpush1.bf16.msra.mxu0 %v1721_v28  ;;  %v1807_v28 = vld [vmem:[#allocation8 + $0x38] sm:$0xff]  }
  0x8b   :  { %1027 = vmatpush1.bf16.msra.mxu1 %v1724_v29  ;;  %987 = vmatprep.subr.bf16.mxu0 %v1729_v30  ;;  %v1931_v29 = vmov 0.0   ;;  %v1808_v30 = vld [vmem:[#allocation8 + $0x30] sm:$0xff]  }
  0x8c   :  { %1028 = vmatprep.subr.bf16.mxu1 %v1732_v31  ;;  %v1809_v31 = vld [vmem:[#allocation8 + $0x28] sm:$0xff]  }
  0x8e   :  { %988 = vmatpush1.bf16.msra.mxu0 %v1727_v32  ;;  %v1810_v32 = vld [vmem:[#allocation8 + $0x20] sm:$0xff]  }
  0x8f   :  { %1029 = vmatpush1.bf16.msra.mxu1 %v1730_v33  ;;  %989 = vmatprep.subr.bf16.mxu0 %v1735_v36  ;;  %v1811_v33 = vld [vmem:[#allocation8 + $0x18] sm:$0xff]  }
  0x90   :  { %1030 = vmatprep.subr.bf16.mxu1 %v1738_v37 }
  0x92   :  { %990 = vmatpush1.bf16.msra.mxu0 %v1733_v40 }
  0x93   :  { %1031 = vmatpush1.bf16.msra.mxu1 %v1736_v41  ;;  %991 = vmatprep.subr.bf16.mxu0 %v1741_v42  ;;  %v215_v42 = vlaneseq }
  0x94   :  { %1032 = vmatprep.subr.bf16.mxu1 %v1744_v43 }
  0x95   :  { %v216_v43 = vshrl.u32 %v215_v42, 7 }
  0x96   :  { %992 = vmatpush2.bf16.msra.mxu0 %v1739_v44 }
  0x97   :  { %1033 = vmatpush2.bf16.msra.mxu1 %v1742_v45  ;;  %993 = vmatprep.subr.bf16.mxu0 %v1747_v46  ;;  %v217_v44 = vsub.s32 0, %v216_v43  ;;  %v213_v45 = vld [vmem:[%s2012_s2] sm:$0x3]  ;;  %v221_v46 = vsub.s32 1, %v216_v43 }
  0x98   :  { %1034 = vmatprep.subr.bf16.mxu1 %v1750_v47 }
  0x99   :  { %v218_v47 = vrot.slane %v213_v45, %v217_v44 }
  0x9a   :  { %994 = vmatpush2.bf16.msra.mxu0 %v1745_v48  ;;  %v222_v48 = vrot.slane %v213_v45, %v221_v46 }
  0x9b   :  { %1035 = vmatpush2.bf16.msra.mxu1 %v1748_v49  ;;  %995 = vmatprep.subr.bf16.mxu0 %v1753_v50 }
  0x9c   :  { %1036 = vmatprep.subr.bf16.mxu1 %v1756_v51 }
  0x9e   :  { %996 = vmatpush2.bf16.msra.mxu0 %v1751_v52 }
  0x9f   :  { %1037 = vmatpush2.bf16.msra.mxu1 %v1754_v53  ;;  %997 = vmatprep.subr.bf16.mxu0 %v1759_v54 }
  0xa0   :  { %1038 = vmatprep.subr.bf16.mxu1 %v1762_v55 }
  0xa2   :  { %998 = vmatpush2.bf16.msra.mxu0 %v1757_v56 }
  0xa3   :  { %1039 = vmatpush2.bf16.msra.mxu1 %v1760_v57  ;;  %999 = vmatprep.subr.bf16.mxu0 %v1765_v58 }
  0xa4   :  { %1040 = vmatprep.subr.bf16.mxu1 %v1768_v59 }
  0xa6   :  { %1000 = vmatpush2.bf16.msra.mxu0 %v1763_v60 }
  0xa7   :  { %1041 = vmatpush2.bf16.msra.mxu1 %v1766_v61  ;;  %1001 = vmatprep.subr.bf16.mxu0 %v1771_v62 }
  0xa8   :  { %1042 = vmatprep.subr.bf16.mxu1 %v1774_v63 }
  0xaa   :  { %1002 = vmatpush2.bf16.msra.mxu0 %v1769_v0 }
  0xab   :  { %1043 = vmatpush2.bf16.msra.mxu1 %v1772_v1  ;;  %1003 = vmatprep.subr.bf16.mxu0 %v1777_v2 }
  0xac   :  { %1044 = vmatprep.subr.bf16.mxu1 %v1780_v3 }
  0xae   :  { %1004 = vmatpush2.bf16.msra.mxu0 %v1775_v4 }
  0xaf   :  { %1045 = vmatpush2.bf16.msra.mxu1 %v1778_v5  ;;  %1005 = vmatprep.subr.bf16.mxu0 %v1783_v6  ;;  %v1812_v5 = vld [vmem:[#allocation8 + $0x10] sm:$0xff]   ;;  %v1813_v6 = vld [vmem:[#allocation8 + $0x8] sm:$0xff]  }
  0xb0   :  { %1046 = vmatprep.subr.bf16.mxu1 %v1786_v7  ;;  %v1814_v7 = vld [vmem:[#allocation8] sm:$0xff]  }
  0xb2   :  { %1006 = vmatpush2.bf16.msra.mxu0 %v1781_v8 }
  0xb3   :  { %1047 = vmatpush2.bf16.msra.mxu1 %v1784_v9  ;;  %1529 = vmatprep.subr.bf16.mxu0 %v1791_v12  ;;  %v1503_v9 = vld [vmem:[%s2014_s4] ss:$0 sm:$0xff]  ;;  %s1895_s4 = scalar_lea.vmem %s1357_s27, 128 }
  0xb4   :  { %1560 = vmatprep.subr.bf16.mxu1 %v1931_v29  ;;  %p1896_p6 = scmp.ne.s32.totalorder %s1357_s27, %s1895_s4  ;;  %p1901_p8 = scmp.lt.s32.totalorder %s1895_s4, %s1895_s4 }
  0xb5   :  { %1008 = vmatmul.mubr.bf16.vlgmr.msra.gmra.mxu0 %v1371_v10 }
  0xb6   :  { %1049 = vmatmul.mubr.bf16.vlgmr.msra.gmra.mxu1 %v1373_v11  ;;  %1530 = vmatpush3.bf16.msra.mxu0 %v1792_v13  ;;  %p1902_p9 = por %p1901_p8, %p1900_p7 }
  0xb7   :  { %1531 = vmatprep.subr.bf16.mxu0 %v1793_v14  ;;  %1561 = vmatpush3.bf16.msra.mxu1 %v1807_v28 }
  0xb8   :  { %1562 = vmatprep.subr.bf16.mxu1 %v1931_v29  ;;  %1576 = vmatprep.mubr.msk.bf16.mxu1 %vm1932_vm0, %v1931_v29  ;;  %p1903_p10 = pnand %p1902_p9, %p1896_p6 }
  0xba   :  { %1532 = vmatpush3.bf16.msra.mxu0 %v1794_v15 }
  0xbb   :  { %1533 = vmatprep.subr.bf16.mxu0 %v1795_v16  ;;  %1563 = vmatpush3.bf16.msra.mxu1 %v1808_v30 }
  0xbc   :  { %1564 = vmatprep.subr.bf16.mxu1 %v1931_v29 }
  0xbe   :  { %1534 = vmatpush3.bf16.msra.mxu0 %v1796_v17  ;;  %v1520_v17 = vld [vmem:[%s2016_s6] ss:$0 sm:$0xff] }
  0xbf   :  { %1535 = vmatprep.subr.bf16.mxu0 %v1797_v18  ;;  %1565 = vmatpush3.bf16.msra.mxu1 %v1809_v31 }
  0xc0   :  { %1566 = vmatprep.subr.bf16.mxu1 %v1931_v29 }
  0xc2   :  { %1536 = vmatpush3.bf16.msra.mxu0 %v1798_v19 }
  0xc3   :  { %1537 = vmatprep.subr.bf16.mxu0 %v1799_v20  ;;  %1567 = vmatpush3.bf16.msra.mxu1 %v1810_v32 }
  0xc4   :  { %1568 = vmatprep.subr.bf16.mxu1 %v1931_v29 }
  0xc6   :  { %1538 = vmatpush3.bf16.msra.mxu0 %v1800_v21 }
  0xc7   :  { %1539 = vmatprep.subr.bf16.mxu0 %v1801_v22  ;;  %1569 = vmatpush3.bf16.msra.mxu1 %v1811_v33 }
  0xc8   :  { %1570 = vmatprep.subr.bf16.mxu1 %v1931_v29 }
  0xca   :  { %1540 = vmatpush3.bf16.msra.mxu0 %v1802_v23 }
  0xcb   :  { %1541 = vmatprep.subr.bf16.mxu0 %v1803_v24  ;;  %1571 = vmatpush3.bf16.msra.mxu1 %v1812_v5 }
  0xcc   :  { %1572 = vmatprep.subr.bf16.mxu1 %v1931_v29 }
  0xce   :  { %1542 = vmatpush3.bf16.msra.mxu0 %v1804_v25 }
  0xcf   :  { %1543 = vmatprep.subr.bf16.mxu0 %v1805_v26  ;;  %1573 = vmatpush3.bf16.msra.mxu1 %v1813_v6 }
  0xd0   :  { %1574 = vmatprep.subr.bf16.mxu1 %v1931_v29 }
  0xd2   :  { %1544 = vmatpush3.bf16.msra.mxu0 %v1806_v27 }
  0xd3   :  { %1575 = vmatpush3.bf16.msra.mxu1 %v1814_v7 }
 0x135   :  { %v927_v34 = vpop.f32.mrf.mxu0 }
 0x136   :  { %v968_v35 = vpop.f32.mrf.mxu1  ;;  %v928_v49 = vadd.f32 %v927_v34, %v218_v47 }
 0x137   :  { %v929_v36 = vpop.f32.mrf.mxu0 }
 0x138   :  { %v970_v37 = vpop.f32.mrf.mxu1  ;;  %v930_v50 = vadd.f32 %v929_v36, %v222_v48  ;;  %v969_v51 = vadd.f32 %v968_v35, %v928_v49 }
 0x139   :  { %v931_v38 = vpop.f32.mrf.mxu0 }
 0x13a   :  { %v972_v39 = vpop.f32.mrf.mxu1  ;;  %v971_v54 = vadd.f32 %v970_v37, %v930_v50 }
 0x13b   :  { %v932_v40 = vpop.f32.mrf.mxu0 }
 0x13c   :  { %v973_v41 = vpop.f32.mrf.mxu1 }
 0x175   :  { %v1009_v52 = vpop.f32.mrf.mxu0 }
 0x176   :  { %v1050_v53 = vpop.f32.mrf.mxu1  ;;  %v1010_v55 = vadd.f32 %v1009_v52, %v969_v51 }
 0x177   :  { %v1011_v56 = vpop.f32.mrf.mxu0 }
 0x178   :  { %v1052_v57 = vpop.f32.mrf.mxu1  ;;  %v1051_v58 = vadd.f32 %v1050_v53, %v1010_v55  ;;  %v1012_v59 = vadd.f32 %v1011_v56, %v971_v54 }
 0x179   :  { %v1013_v60 = vpop.f32.mrf.mxu0 }
 0x17a   :  { %v1054_v61 = vpop.f32.mrf.mxu1  ;;  %v1053_v62 = vadd.f32 %v1052_v57, %v1012_v59  ;;  %v1057_v63 = vmax.f32 %v1051_v58, 0.0 }
 0x17b   :  { %v1014_v0 = vpop.f32.mrf.mxu0 }
 0x17c   :  { %v1055_v1 = vpop.f32.mrf.mxu1  ;;  %v1058_v2 = vmax.f32 %v1053_v62, 0.0  ;;  %v1059_v4 = vpack.c.bf16 %v1057_v63, %v1057_v63 }
 0x17e   :  { %v1060_v3 = vpack.c.bf16 %v1058_v2, %v1058_v2 }
 0x180   :  { %1228 = vmatprep.mubr.bf16.mxu0 %v1060_v3 }
 0x181   :  { %1229 = vmatmul.mubr.bf16.vlgmr.msra.gmra.mxu0 %v1059_v4 }
 0x241   :  { %v1545_v8 = vpop.f32.mrf.mxu0 }
 0x243   :  { %v1546_v10 = vpop.f32.mrf.mxu0 }
 0x244   :  { %v1547_v11 = vadd.f32 %v1546_v10, %v1545_v8 }
 0x245   :  { %v1548_v12 = vpop.f32.mrf.mxu0 }
 0x246   :  { %v1231_v13 = vadd.f32 %v1547_v11, %v1503_v9 }
 0x247   :  { %v1549_v14 = vpop.f32.mrf.mxu0 }
 0x248   :  { %v1236_v15 = vmax.f32 %v1231_v13, 0.0 }
 0x24a   :  { %v1237_v16 = vpack.c.bf16 %v1236_v15, %v1236_v15 }
 0x24c   :  { %1577 = vmatmul.mubr.bf16.vlgmr.msra.gmra.mxu1 %v1237_v16 }
 0x30c   :  { %v1343_v18 = vpop.f32.mrf.mxu1 }
 0x30d   :  { %v1344_v19 = vadd.f32 %v1520_v17, %v1343_v18 }
 0x30e   :  { %v1578_v20 = vpop.f32.mrf.mxu1 }
 0x30f   :  { %1349 = vst [vmem:[#allocation10] sm:$0xff] %v1344_v19 }
 0x310   :  { %v1346_v21 = vpop.f32.mrf.mxu1 }
 0x311   :  { %1906 = shalt.err (!%p1903_p10)
}
 0x312   :  { %1359 = dma.vmem_to_hbm [thread:$0]  %s1357_s27, 128, %s2017_s7, [#allocation4]   ;;  %v1579_v22 = vpop.f32.mrf.mxu1 }
 0x313   :  { %1921 = dma.done.wait [#allocation4], 128  }
 0x314   :  { %1922 = vsyncadd [#allocation4], 4294967168 }
 0x315   :  { %1363 = vsyncpa [#allocation3], 1 }
 0x316   :  { %1364 = vsyncpa [#allocation6], 1 }
 0x317   :  { %1365 = vsyncpa [#allocation9], 1 }
 0x318   :  { %1366 = vsyncpa [#allocation4], 1 }

</bundles_post_ra>
